<compile_context>
chip_gen: v6e
topology: v6e:2x2x1
jax: 0.10.0
libtpu: 0.0.40
codegen_flags: <defaults>
</compile_context>

<pallas_src>
import jax
import jax.numpy as jnp
from jax.experimental import pallas as pl
from jax.experimental.pallas import tpu as pltpu

TB = 256  # batch rows (lanes) per grid step


def mlp_kernel(x_ref, w1_ref, b1_ref, w2_ref, b2_ref, o_ref):
    # x_ref : (2, TB)   features on sublanes, batch on lanes
    # w1_ref: (50, 2)   [hidden, in]
    # b1_ref: (50, 1)
    # w2_ref: (50, 1)   fc2 weight, pre-transposed in wrapper
    # b2_ref: (1, 1)
    # o_ref : (1, TB)   lane-dense output (batch on lanes)

    # fc1 + ReLU: K=2 -> two broadcast FMAs on the VPU, no MXU.
    h = (w1_ref[:, 0:1] * x_ref[0:1, :]
         + w1_ref[:, 1:2] * x_ref[1:2, :]
         + b1_ref[...])                      # (50, TB)
    h = jnp.maximum(h, 0.0)

    # fc2 + ReLU: elementwise mul + cross-sublane reduce (XLU), lane-dense result.
    y = jnp.sum(h * w2_ref[...], axis=0, keepdims=True) + b2_ref[...]   # (1, TB)
    o_ref[...] = jnp.maximum(y, 0.0).astype(o_ref.dtype)


def net_forward(x, w1, b1, w2, b2):
    """Forward pass matching PyTorch Net.

    x : (B, 2)  float32
    w1: (50, 2) float32   (PyTorch fc1.weight layout [out, in])
    b1: (50,)   float32
    w2: (1, 50) float32   (PyTorch fc2.weight layout [out, in])
    b2: (1,)    float32
    returns (B, 1) float32
    """
    B = x.shape[0]
    B_pad = pl.cdiv(B, TB) * TB
    n_tiles = B_pad // TB

    # Layout plumbing (outside the kernel): batch onto the lane axis.
    x_t = jnp.zeros((2, B_pad), jnp.float32).at[:, :B].set(x.T)
    b1_c = b1.reshape(50, 1).astype(jnp.float32)
    w2_c = w2.reshape(1, 50).T.astype(jnp.float32)        # (50, 1)
    b2_c = b2.reshape(1, 1).astype(jnp.float32)
    w1_c = w1.astype(jnp.float32)                         # (50, 2)

    flops = 2 * B_pad * (2 * 50 + 50 * 1)
    bytes_accessed = 4 * (B_pad * 2 + B_pad * 1 + 50 * 2 + 50 + 50 + 1)

    out = pl.pallas_call(
        mlp_kernel,
        out_shape=jax.ShapeDtypeStruct((1, B_pad), jnp.float32),
        grid=(n_tiles,),
        in_specs=[
            pl.BlockSpec((2, TB), lambda i: (0, i)),     # x tile (pipelined)
            pl.BlockSpec((50, 2), lambda i: (0, 0)),     # w1   (VMEM-resident)
            pl.BlockSpec((50, 1), lambda i: (0, 0)),     # b1
            pl.BlockSpec((50, 1), lambda i: (0, 0)),     # w2^T
            pl.BlockSpec((1, 1), lambda i: (0, 0)),      # b2
        ],
        out_specs=pl.BlockSpec((1, TB), lambda i: (0, i)),
        compiler_params=pltpu.CompilerParams(
            dimension_semantics=("parallel",)),
        cost_estimate=pl.CostEstimate(
            flops=flops, transcendentals=0, bytes_accessed=bytes_accessed),
    )(x_t, w1_c, b1_c, w2_c, b2_c)

    # Back to PyTorch layout (B, 1).
    return out[:, :B].T


def init_params(key):
    # PyTorch-default-style init: U(-1/sqrt(fan_in), 1/sqrt(fan_in)), PyTorch layouts.
    k1, k2, k3, k4 = jax.random.split(key, 4)
    bound1 = 1.0 / jnp.sqrt(2.0)
    bound2 = 1.0 / jnp.sqrt(50.0)
    w1 = jax.random.uniform(k1, (50, 2), jnp.float32, -bound1, bound1)
    b1 = jax.random.uniform(k2, (50,), jnp.float32, -bound1, bound1)
    w2 = jax.random.uniform(k3, (1, 50), jnp.float32, -bound2, bound2)
    b2 = jax.random.uniform(k4, (1,), jnp.float32, -bound2, bound2)
    return w1, b1, w2, b2


if __name__ == "__main__":
    key = jax.random.PRNGKey(0)
    w1, b1, w2, b2 = init_params(key)

    # XOR-style input: batch=4, 2 features.
    x = jnp.array([[0.0, 0.0],
                   [0.0, 1.0],
                   [1.0, 0.0],
                   [1.0, 1.0]], dtype=jnp.float32)

    out = net_forward(x, w1, b1, w2, b2)
    jax.block_until_ready(out)

    # Pure-JAX reference (PyTorch semantics: x @ W1.T + b1 -> ReLU -> @ W2.T + b2 -> ReLU).
    ref = jnp.maximum(jnp.maximum(x @ w1.T + b1, 0.0) @ w2.T + b2, 0.0)
    assert out.shape == (4, 1)
    assert jnp.allclose(out, ref, atol=1e-5), "mismatch vs reference"

    print("KERNEL_OK")
</pallas_src>

<mosaic_0001>
module attributes {stable_mosaic.version = 11 : i64} {
  func.func @mlp_kernel(%arg0: i32, %arg1: memref<2x256xf32, #tpu.memory_space<vmem>>, %arg2: memref<50x2xf32, #tpu.memory_space<vmem>>, %arg3: memref<50x1xf32, #tpu.memory_space<vmem>>, %arg4: memref<50x1xf32, #tpu.memory_space<vmem>>, %arg5: memref<1x1xf32, #tpu.memory_space<vmem>>, %arg6: memref<1x256xf32, #tpu.memory_space<vmem>>) attributes {dimension_semantics = [#tpu.dimension_semantics<parallel>], iteration_bounds = array<i64: 1>, scalar_prefetch = 0 : i64, scratch_operands = 0 : i64, tpu.core_type = #tpu.core_type<tc>, window_params = [{transform_indices = @transform_0, window_bounds = array<i64: 2, 256>}, {pipeline_mode = #tpu.pipeline_mode<synchronous>, transform_indices = @transform_1, window_bounds = array<i64: 50, 2>}, {pipeline_mode = #tpu.pipeline_mode<synchronous>, transform_indices = @transform_2, window_bounds = array<i64: 50, 1>}, {pipeline_mode = #tpu.pipeline_mode<synchronous>, transform_indices = @transform_3, window_bounds = array<i64: 50, 1>}, {pipeline_mode = #tpu.pipeline_mode<synchronous>, transform_indices = @transform_4, window_bounds = array<i64: 1, 1>}, {transform_indices = @transform_5, window_bounds = array<i64: 1, 256>}]} {
    %c0 = arith.constant 0 : index
    %c0_0 = arith.constant 0 : index
    %0 = vector.load %arg2[%c0, %c0_0] : memref<50x2xf32, #tpu.memory_space<vmem>>, vector<50x1xf32>
    %c0_1 = arith.constant 0 : index
    %c0_2 = arith.constant 0 : index
    %1 = vector.load %arg1[%c0_1, %c0_2] : memref<2x256xf32, #tpu.memory_space<vmem>>, vector<1x256xf32>
    %2 = vector.broadcast %0 : vector<50x1xf32> to vector<50x256xf32>
    %3 = vector.broadcast %1 : vector<1x256xf32> to vector<50x256xf32>
    %4 = arith.mulf %2, %3 : vector<50x256xf32>
    %c0_3 = arith.constant 0 : index
    %c1 = arith.constant 1 : index
    %5 = vector.load %arg2[%c0_3, %c1] : memref<50x2xf32, #tpu.memory_space<vmem>>, vector<50x1xf32>
    %c1_4 = arith.constant 1 : index
    %c0_5 = arith.constant 0 : index
    %6 = vector.load %arg1[%c1_4, %c0_5] : memref<2x256xf32, #tpu.memory_space<vmem>>, vector<1x256xf32>
    %7 = vector.broadcast %5 : vector<50x1xf32> to vector<50x256xf32>
    %8 = vector.broadcast %6 : vector<1x256xf32> to vector<50x256xf32>
    %9 = arith.mulf %7, %8 : vector<50x256xf32>
    %10 = arith.addf %4, %9 : vector<50x256xf32>
    %c0_6 = arith.constant 0 : index
    %c0_7 = arith.constant 0 : index
    %11 = vector.load %arg3[%c0_6, %c0_7] : memref<50x1xf32, #tpu.memory_space<vmem>>, vector<50x1xf32>
    %12 = vector.broadcast %11 : vector<50x1xf32> to vector<50x256xf32>
    %13 = arith.addf %10, %12 : vector<50x256xf32>
    %cst = arith.constant 0.000000e+00 : f32
    %14 = vector.broadcast %cst : f32 to vector<50x256xf32>
    %15 = arith.maximumf %13, %14 : vector<50x256xf32>
    %c0_8 = arith.constant 0 : index
    %c0_9 = arith.constant 0 : index
    %16 = vector.load %arg4[%c0_8, %c0_9] : memref<50x1xf32, #tpu.memory_space<vmem>>, vector<50x1xf32>
    %17 = vector.broadcast %16 : vector<50x1xf32> to vector<50x256xf32>
    %18 = arith.mulf %15, %17 : vector<50x256xf32>
    %cst_10 = arith.constant dense<0.000000e+00> : vector<256xf32>
    %19 = vector.multi_reduction <add>, %18, %cst_10 [0] : vector<50x256xf32> to vector<256xf32>
    %20 = vector.shape_cast %19 : vector<256xf32> to vector<1x256xf32>
    %c0_11 = arith.constant 0 : index
    %c0_12 = arith.constant 0 : index
    %21 = vector.load %arg5[%c0_11, %c0_12] : memref<1x1xf32, #tpu.memory_space<vmem>>, vector<1x1xf32>
    %22 = vector.broadcast %21 : vector<1x1xf32> to vector<1x256xf32>
    %23 = arith.addf %20, %22 : vector<1x256xf32>
    %cst_13 = arith.constant 0.000000e+00 : f32
    %24 = vector.broadcast %cst_13 : f32 to vector<1x256xf32>
    %25 = arith.maximumf %23, %24 : vector<1x256xf32>
    %c0_14 = arith.constant 0 : index
    %c0_15 = arith.constant 0 : index
    %26 = vector.load %arg6[%c0_14, %c0_15] : memref<1x256xf32, #tpu.memory_space<vmem>>, vector<1x256xf32>
    tpu.vector_store %arg6[%c0_14, %c0_15], %25 {strides = array<i32>} : memref<1x256xf32, #tpu.memory_space<vmem>>, vector<1x256xf32>,
    return
  }
  func.func @transform_0(%arg0: i32) -> (i32, i32) {
    %c0_i32 = arith.constant 0 : i32
    %c0_i32_0 = arith.constant 0 : i32
    return %c0_i32, %arg0 : i32, i32
  }
  func.func @transform_1(%arg0: i32) -> (i32, i32) {
    %c0_i32 = arith.constant 0 : i32
    %c0_i32_0 = arith.constant 0 : i32
    %c0_i32_1 = arith.constant 0 : i32
    return %c0_i32, %c0_i32_0 : i32, i32
  }
  func.func @transform_2(%arg0: i32) -> (i32, i32) {
    %c0_i32 = arith.constant 0 : i32
    %c0_i32_0 = arith.constant 0 : i32
    %c0_i32_1 = arith.constant 0 : i32
    return %c0_i32, %c0_i32_0 : i32, i32
  }
  func.func @transform_3(%arg0: i32) -> (i32, i32) {
    %c0_i32 = arith.constant 0 : i32
    %c0_i32_0 = arith.constant 0 : i32
    %c0_i32_1 = arith.constant 0 : i32
    return %c0_i32, %c0_i32_0 : i32, i32
  }
  func.func @transform_4(%arg0: i32) -> (i32, i32) {
    %c0_i32 = arith.constant 0 : i32
    %c0_i32_0 = arith.constant 0 : i32
    %c0_i32_1 = arith.constant 0 : i32
    return %c0_i32, %c0_i32_0 : i32, i32
  }
  func.func @transform_5(%arg0: i32) -> (i32, i32) {
    %c0_i32 = arith.constant 0 : i32
    %c0_i32_0 = arith.constant 0 : i32
    return %c0_i32, %arg0 : i32, i32
  }
}

</mosaic_0001>

<bundles_post_ra>
// kernel: tpu_custom_call.1
= control target key start
LH: loop header
LB: loop body
LE: loop exit
PB: predicated region body
PF: predicated region fallthrough
CT: control target
= control target key end

     0   :  { %s546_s0 = inlined_call_operand.vmem [shape: f32[2,256], index: 0, kind: input, shape index: {}]   ;;  %s547_s1 = inlined_call_operand.vmem [shape: f32[50,2], index: 1, kind: input, shape index: {}]   ;;  %s548_s2 = inlined_call_operand.vmem [shape: f32[50,1], index: 2, kind: input, shape index: {}]   ;;  %s549_s3 = inlined_call_operand.vmem [shape: f32[50,1], index: 3, kind: input, shape index: {}]   ;;  %s550_s4 = inlined_call_operand.<no memory space> [shape: f32[1,1], index: 4, kind: input, shape index: {}]   ;;  %s551_s5 = inlined_call_operand.hbm [shape: f32[1,256], index: 5, kind: output, shape index: {}]  }
   0x1   :  { %v10_v0 = vstv %s550_s4 }
   0x2   :  { %11 = vst [vmem:[#allocation2] sm:$0x1] %v10_v0 }
   0x3   :  { %v28_v1 = vld [vmem:[%s547_s1 + $0x28] sm:$0xff]  ;;  %v23_v2 = vld [vmem:[%s547_s1] sm:$0xff]  ;;  %v399_v3 = vmov 1   ;;  %v400_v5 = vmov 0   ;;  %v25_v6 = vld [vmem:[%s547_s1 + $0x10] sm:$0xff] }
   0x4   :  { %373 = vset.pattern.permute.xlu0 %v399_v3  ;;  %369 = vset.pattern.permute.xlu1 %v399_v3  ;;  %v24_v4 = vld [vmem:[%s547_s1 + $0x8] sm:$0xff] }
   0x5   :  { %114 = vperm.xlu0 %373, %v28_v1   ;;  %94 = vperm.xlu1 %369, %v23_v2  }
   0x9   :  { %374 = vset.pattern.permute.xlu0 %v400_v5  ;;  %98 = vperm.xlu1 %369, %v24_v4  }
   0xa   :  { %33 = vperm.xlu0 %374, %v23_v2  }
   0xb   :  { %12 = vsyncpa [#allocation4], 0  ;;  %v26_v7 = vld [vmem:[%s547_s1 + $0x18] sm:$0xff]  ;;  %v161_v8 = vld [vmem:[%s548_s2 + $0x8] sm:$0xff]  ;;  %v67_v37 = vlaneseq  ;;  %vm291_vm0 = vcmask 1041408  }
   0xc   :  { %v160_v9 = vld [vmem:[%s548_s2] sm:$0xff]  ;;  %v162_v11 = vld [vmem:[%s548_s2 + $0x10] sm:$0xff]  ;;  %v163_v12 = vld [vmem:[%s548_s2 + $0x18] sm:$0xff] }
   0xd   :  { %102 = vperm.xlu1 %369, %v25_v6   ;;  %v27_v10 = vld [vmem:[%s547_s1 + $0x20] sm:$0xff]  ;;  %v231_v13 = vld [vmem:[%s549_s3 + $0x8] sm:$0xff]  ;;  %v29_v16 = vld [vmem:[%s547_s1 + $0x30] sm:$0x3]  ;;  %v502_v39 = vshrl.u32 %v67_v37, 7  ;;  %vm347_vm1 = vcmp.lt.s32.totalorder %v67_v37, 256 }
   0xe   :  { %38 = vperm.xlu0 %374, %v24_v4   ;;  %v230_v14 = vld [vmem:[%s549_s3] sm:$0xff]  ;;  %v165_v17 = vld [vmem:[%s548_s2 + $0x28] sm:$0xff]  ;;  %v166_v18 = vld [vmem:[%s548_s2 + $0x30] sm:$0x3] }
   0xf   :  { %v164_v15 = vld [vmem:[%s548_s2 + $0x20] sm:$0xff]  ;;  %v235_v19 = vld [vmem:[%s549_s3 + $0x28] sm:$0xff]  ;;  %v232_v20 = vld [vmem:[%s549_s3 + $0x10] sm:$0xff]  ;;  %v508_v43 = vsub.s32 0, %v502_v39  ;;  %v73_v44 = vsub.s32 1, %v502_v39 }
  0x10   :  { %v313_v21 = vld [vmem:[#allocation2] sm:$0x1]  ;;  %v233_v22 = vld [vmem:[%s549_s3 + $0x18] sm:$0xff]  ;;  %v236_v24 = vld [vmem:[%s549_s3 + $0x30] sm:$0x3] }
  0x11   :  { %106 = vperm.xlu1 %369, %v26_v7   ;;  %v234_v23 = vld [vmem:[%s549_s3 + $0x20] sm:$0xff] }
  0x12   :  { %43 = vperm.xlu0 %374, %v25_v6   ;;  %v30_v42 = vld [vmem:[%s546_s0] ss:$2 sm:$0x3]  ;;  %v364_v46 = vld [vmem:[%s546_s0 + $0x1] ss:$2 sm:$0x3] }
  0x13   :  { %v515_v47 = vrot.slane %v30_v42, %v508_v43  ;;  %v517_v48 = vrot.slane %v30_v42, %v73_v44  ;;  %v125_v50 = vrot.slane %v364_v46, %v508_v43  ;;  %v129_v51 = vrot.slane %v364_v46, %v73_v44  ;;  %s402_s0 = smov [#allocation3]  }
  0x14   :  { %s356_s11 = sshll.u32 %s402_s0, 4  ;;  %s357_s11 = int_to_ptr.vmem [resolvable:$true] %s356_s11 }
  0x15   :  { %370 = vset.pattern.permute.xlu1 %v400_v5  ;;  %s377_s12 = scalar_lea.vmem %s357_s11, 32  ;;  %p382_p1 = scmp.lt.s32.totalorder %s357_s11, %s357_s11 }
  0x16   :  { %48 = vperm.xlu0 %374, %v26_v7   ;;  %174 = vperm.xlu1 %370, %v161_v8   ;;  %p378_p0 = scmp.ne.s32.totalorder %s357_s11, %s377_s12  ;;  %p383_p2 = scmp.lt.s32.totalorder %s377_s12, %s377_s12 }
  0x18   :  { %p384_p3 = por %p383_p2, %p382_p1 }
  0x1a   :  { %169 = vperm.xlu0 %374, %v160_v9   ;;  %371 = vset.pattern.permute.xlu1 %v399_v3  ;;  %p385_p4 = pnand %p384_p3, %p378_p0 }
  0x1b   :  { %110 = vperm.xlu1 %371, %v27_v10  }
  0x1e   :  { %53 = vperm.xlu0 %374, %v27_v10  }
  0x1f   :  { %372 = vset.pattern.permute.xlu1 %v400_v5 }
  0x20   :  { %58 = vperm.xlu1 %372, %v28_v1  }
  0x22   :  { %179 = vperm.xlu0 %374, %v162_v11  }
  0x24   :  { %184 = vperm.xlu1 %372, %v163_v12  }
  0x26   :  { %244 = vperm.xlu0 %374, %v231_v13  }
  0x28   :  { %239 = vperm.xlu1 %372, %v230_v14  }
  0x2a   :  { %189 = vperm.xlu0 %374, %v164_v15  }
  0x2c   :  { %63 = vperm.xlu1 %372, %v29_v16  }
  0x2e   :  { %194 = vperm.xlu0 %374, %v165_v17  }
  0x30   :  { %375 = vset.pattern.permute.xlu1 %v399_v3 }
  0x31   :  { %118 = vperm.xlu1 %375, %v29_v16  }
  0x32   :  { %199 = vperm.xlu0 %374, %v166_v18  }
  0x35   :  { %376 = vset.pattern.permute.xlu1 %v400_v5 }
  0x36   :  { %264 = vperm.xlu0 %374, %v235_v19   ;;  %249 = vperm.xlu1 %376, %v232_v20  }
  0x3a   :  { %316 = vperm.xlu0 %374, %v313_v21   ;;  %254 = vperm.xlu1 %376, %v233_v22  }
  0x3e   :  { %259 = vperm.xlu1 %376, %v234_v23  }
  0x42   :  { %269 = vperm.xlu1 %376, %v236_v24  }
  0x80   :  { %v95_v25 = vpop.permute.xlu1 %94  ;;  %v499_v26 = vpop.permute.xlu0 %114 }
  0x81   :  { %v132_v0 = vmul.f32 %v125_v50, %v95_v25  ;;  %v133_v1 = vmul.f32 %v129_v51, %v95_v25 }
  0x84   :  { %v99_v27 = vpop.permute.xlu1 %98 }
  0x85   :  { %v34_v28 = vpop.permute.xlu0 %33  ;;  %v134_v59 = vmul.f32 %v125_v50, %v99_v27  ;;  %v135_v60 = vmul.f32 %v129_v51, %v99_v27 }
  0x86   :  { %v77_v55 = vmul.f32 %v515_v47, %v34_v28  ;;  %v78_v56 = vmul.f32 %v517_v48, %v34_v28 }
  0x88   :  { %v103_v29 = vpop.permute.xlu1 %102  ;;  %v146_v9 = vadd.f32 %v132_v0, %v77_v55  ;;  %v147_v10 = vadd.f32 %v133_v1, %v78_v56 }
  0x89   :  { %v39_v30 = vpop.permute.xlu0 %38  ;;  %v136_v2 = vmul.f32 %v125_v50, %v103_v29  ;;  %v137_v3 = vmul.f32 %v129_v51, %v103_v29 }
  0x8a   :  { %v79_v53 = vmul.f32 %v515_v47, %v39_v30  ;;  %v80_v54 = vmul.f32 %v517_v48, %v39_v30 }
  0x8c   :  { %v107_v31 = vpop.permute.xlu1 %106  ;;  %v148_v7 = vadd.f32 %v134_v59, %v79_v53  ;;  %v149_v8 = vadd.f32 %v135_v60, %v80_v54 }
  0x8d   :  { %v44_v32 = vpop.permute.xlu0 %43  ;;  %v138_v5 = vmul.f32 %v125_v50, %v107_v31  ;;  %v139_v6 = vmul.f32 %v129_v51, %v107_v31 }
  0x8e   :  { %v81_v57 = vmul.f32 %v515_v47, %v44_v32  ;;  %v82_v58 = vmul.f32 %v517_v48, %v44_v32  ;;  %v142_v32 = vmul.f32 %v125_v50, %v499_v26 }
  0x90   :  { %v150_v11 = vadd.f32 %v136_v2, %v81_v57  ;;  %v151_v12 = vadd.f32 %v137_v3, %v82_v58 }
  0x91   :  { %v49_v33 = vpop.permute.xlu0 %48  ;;  %v175_v34 = vpop.permute.xlu1 %174 }
  0x92   :  { %v83_v61 = vmul.f32 %v515_v47, %v49_v33  ;;  %v84_v62 = vmul.f32 %v517_v48, %v49_v33  ;;  %v204_v13 = vadd.f32 %v175_v34, %v148_v7  ;;  %v205_v14 = vadd.f32 %v175_v34, %v149_v8 }
  0x93   :  { %v143_v33 = vmul.f32 %v129_v51, %v499_v26 }
  0x94   :  { %v152_v15 = vadd.f32 %v138_v5, %v83_v61  ;;  %v153_v16 = vadd.f32 %v139_v6, %v84_v62  ;;  %v218_v34 = vmax.f32 %v204_v13, 0.0 }
  0x95   :  { %v170_v35 = vpop.permute.xlu0 %169 }
  0x96   :  { %v111_v36 = vpop.permute.xlu1 %110  ;;  %v202_v17 = vadd.f32 %v170_v35, %v146_v9  ;;  %v203_v18 = vadd.f32 %v170_v35, %v147_v10  ;;  %v219_v35 = vmax.f32 %v205_v14, 0.0 }
  0x97   :  { %v140_v21 = vmul.f32 %v125_v50, %v111_v36  ;;  %v141_v22 = vmul.f32 %v129_v51, %v111_v36 }
  0x98   :  { %v216_v42 = vmax.f32 %v202_v17, 0.0 }
  0x99   :  { %v54_v38 = vpop.permute.xlu0 %53 }
  0x9a   :  { %v85_v19 = vmul.f32 %v515_v47, %v54_v38  ;;  %v86_v20 = vmul.f32 %v517_v48, %v54_v38  ;;  %v217_v38 = vmax.f32 %v203_v18, 0.0 }
  0x9b   :  { %v59_v40 = vpop.permute.xlu1 %58 }
  0x9c   :  { %v87_v23 = vmul.f32 %v515_v47, %v59_v40  ;;  %v88_v24 = vmul.f32 %v517_v48, %v59_v40  ;;  %v154_v44 = vadd.f32 %v140_v21, %v85_v19  ;;  %v155_v36 = vadd.f32 %v141_v22, %v86_v20 }
  0x9d   :  { %v180_v41 = vpop.permute.xlu0 %179 }
  0x9e   :  { %v206_v28 = vadd.f32 %v180_v41, %v150_v11  ;;  %v207_v29 = vadd.f32 %v180_v41, %v151_v12  ;;  %v156_v46 = vadd.f32 %v142_v32, %v87_v23  ;;  %v157_v53 = vadd.f32 %v143_v33, %v88_v24 }
  0x9f   :  { %v185_v45 = vpop.permute.xlu1 %184 }
  0xa0   :  { %v208_v30 = vadd.f32 %v185_v45, %v152_v15  ;;  %v209_v31 = vadd.f32 %v185_v45, %v153_v16  ;;  %v220_v55 = vmax.f32 %v206_v28, 0.0  ;;  %v221_v56 = vmax.f32 %v207_v29, 0.0 }
  0xa1   :  { %v519_v49 = vpop.permute.xlu0 %244 }
  0xa2   :  { %v222_v57 = vmax.f32 %v208_v30, 0.0  ;;  %v223_v41 = vmax.f32 %v209_v31, 0.0  ;;  %v274_v62 = vmul.f32 %v519_v49, %v218_v34  ;;  %v275_v0 = vmul.f32 %v519_v49, %v219_v35 }
  0xa3   :  { %v240_v52 = vpop.permute.xlu1 %239 }
  0xa4   :  { %v272_v45 = vmul.f32 %v240_v52, %v216_v42  ;;  %v273_v59 = vmul.f32 %v240_v52, %v217_v38 }
  0xa5   :  { %v190_v63 = vpop.permute.xlu0 %189 }
  0xa6   :  { %v210_v1 = vadd.f32 %v190_v63, %v154_v44  ;;  %v211_v2 = vadd.f32 %v190_v63, %v155_v36  ;;  %v286_v9 = vadd.f32 %v274_v62, %v272_v45  ;;  %v300_v52 = vadd.f32 %v275_v0, %v273_v59 }
  0xa7   :  { %v64_v4 = vpop.permute.xlu1 %63 }
  0xa8   :  { %v89_v60 = vmul.f32 %v515_v47, %v64_v4  ;;  %v90_v26 = vmul.f32 %v517_v48, %v64_v4  ;;  %v224_v11 = vmax.f32 %v210_v1, 0.0  ;;  %v225_v48 = vmax.f32 %v211_v2, 0.0 }
  0xa9   :  { %v195_v25 = vpop.permute.xlu0 %194 }
  0xaa   :  { %v212_v6 = vadd.f32 %v195_v25, %v156_v46  ;;  %v213_v7 = vadd.f32 %v195_v25, %v157_v53 }
  0xac   :  { %v119_v27 = vpop.permute.xlu1 %118  ;;  %v226_v15 = vmax.f32 %v212_v6, 0.0  ;;  %v227_v63 = vmax.f32 %v213_v7, 0.0 }
  0xad   :  { %v144_v54 = vmul.f32 %v125_v50, %v119_v27  ;;  %v145_v40 = vmul.f32 %v129_v51, %v119_v27  ;;  %v200_v61 = vpop.permute.xlu0 %199 }
  0xaf   :  { %v158_v50 = vadd.f32 %v144_v54, %v89_v60  ;;  %v159_v51 = vadd.f32 %v145_v40, %v90_v26 }
  0xb1   :  { %v250_v58 = vpop.permute.xlu1 %249  ;;  %v214_v4 = vadd.f32 %v200_v61, %v158_v50  ;;  %v215_v12 = vadd.f32 %v200_v61, %v159_v51  ;;  %v265_v13 = vpop.permute.xlu0 %264 }
  0xb2   :  { %v276_v3 = vmul.f32 %v250_v58, %v220_v55  ;;  %v277_v5 = vmul.f32 %v250_v58, %v221_v56  ;;  %v282_v21 = vmul.f32 %v265_v13, %v226_v15  ;;  %v283_v22 = vmul.f32 %v265_v13, %v227_v63 }
  0xb3   :  { %v228_v23 = vmax.f32 %v214_v4, 0.0  ;;  %v229_v24 = vmax.f32 %v215_v12, 0.0  ;;  %v401_v56 = vmov 1966171168  }
  0xb4   :  { %v287_v14 = vadd.f32 %v286_v9, %v276_v3  ;;  %v301_v49 = vadd.f32 %v300_v52, %v277_v5 }
  0xb5   :  { %v255_v8 = vpop.permute.xlu1 %254 }
  0xb6   :  { %v278_v10 = vmul.f32 %v255_v8, %v222_v57  ;;  %v279_v47 = vmul.f32 %v255_v8, %v223_v41  ;;  %v331_v57 = vunpack.c.l.s4 %v401_v56  ;;  %v317_v41 = vpop.permute.xlu0 %316 }
  0xb7   :  { %v322_v59 = vrot.slane %v317_v41, %v508_v43 }
  0xb8   :  { %v288_v17 = vadd.f32 %v287_v14, %v278_v10  ;;  %v302_v18 = vadd.f32 %v301_v49, %v279_v47  ;;  %v332_v61 = vunpack.c.0.s8 %v331_v57 }
  0xb9   :  { %v260_v16 = vpop.permute.xlu1 %259 }
  0xba   :  { %v280_v19 = vmul.f32 %v260_v16, %v224_v11  ;;  %v281_v20 = vmul.f32 %v260_v16, %v225_v48  ;;  %v335_v50 = vsub.s32 %v332_v61, %v502_v39 }
  0xbc   :  { %v289_v25 = vadd.f32 %v288_v17, %v280_v19  ;;  %v303_v27 = vadd.f32 %v302_v18, %v281_v20 }
  0xbd   :  { %v270_v28 = vpop.permute.xlu1 %269 }
  0xbe   :  { %v290_v29 = vadd.f32 %v289_v25, %v282_v21  ;;  %v304_v30 = vadd.f32 %v303_v27, %v283_v22  ;;  %v284_v31 = vmul.f32 %v270_v28, %v228_v23  ;;  %v285_v32 = vmul.f32 %v270_v28, %v229_v24 }
  0xc0   :  { %v292_v33 = vsel %vm291_vm0, %v284_v31, 0.0  ;;  %v305_v34 = vsel %vm291_vm0, %v285_v32, 0.0 }
  0xc1   :  { %v293_v35 = vadd.f32 %v292_v33, %v290_v29  ;;  %v306_v42 = vadd.f32 %v305_v34, %v304_v30 }
  0xc3   :  { %v294_v38 = vrot.slane %v293_v35, 4  ;;  %v307_v44 = vrot.slane %v306_v42, 4 }
  0xc5   :  { %v295_v36 = vadd.f32 %v294_v38, %v293_v35  ;;  %v308_v46 = vadd.f32 %v307_v44, %v306_v42 }
  0xc7   :  { %v296_v53 = vrot.slane %v295_v36, 2  ;;  %v309_v54 = vrot.slane %v308_v46, 2 }
  0xc9   :  { %v297_v40 = vadd.f32 %v296_v53, %v295_v36  ;;  %v310_v55 = vadd.f32 %v309_v54, %v308_v46 }
  0xcb   :  { %v298_v58 = vrot.slane %v297_v40, 1  ;;  %v311_v45 = vrot.slane %v310_v55, 1 }
  0xcd   :  { %v299_v60 = vadd.f32 %v298_v58, %v297_v40  ;;  %v312_v26 = vadd.f32 %v311_v45, %v310_v55 }
  0xcf   :  { %v323_v62 = vadd.f32 %v322_v59, %v299_v60  ;;  %v324_v0 = vadd.f32 %v322_v59, %v312_v26 }
  0xd1   :  { %v325_v1 = vmax.f32 %v323_v62, 0.0  ;;  %v326_v2 = vmax.f32 %v324_v0, 0.0 }
  0xd3   :  { %v329_v51 = vcombine.low %v325_v1, %v326_v2 }
  0xd5   :  { %v336_v3 = vrot.slane %v329_v51, %v335_v50 }
  0xd7   :  { %v343_v5 = vrot.slane %v336_v3, %v335_v50 }
  0xd9   :  { %349 = vst.msk [vmem:[#allocation3] sm:$0x3] %vm347_vm1, %v343_v5 }
  0xda   :  { %388 = shalt.err (!%p385_p4)
}
  0xdb   :  { %359 = dma.vmem_to_hbm [thread:$0]  %s357_s11, 32, %s551_s5, [#allocation4]  }
  0xdc   :  { %397 = dma.done.wait [#allocation4], 32  }
  0xdd   :  { %398 = vsyncadd [#allocation4], 4294967264 }
  0xde   :  { %363 = vsyncpa [#allocation4], 1 }

</bundles_post_ra>
